<compile_context>
chip_gen: v7x
topology: tpu7x:2x2x1
jax: 0.10.0
libtpu: 0.0.40
codegen_flags: <defaults>
</compile_context>

<pallas_src>
import jax
import jax.numpy as jnp
from jax import lax
from jax.experimental import pallas as pl
from jax.experimental.pallas import tpu as pltpu


def _make_l2_normalize_kernel(eps):
    eps_f = float(eps)

    def kernel(x_ref, o_ref):
        # x_ref: (tile_rows, hidden) in VMEM.
        x = x_ref[...]
        xf = x.astype(jnp.float32)
        sumsq = jnp.sum(xf * xf, axis=-1, keepdims=True)      # (tile_rows, 1), f32
        scale = eps_f * lax.rsqrt(sumsq)                       # eps folded into per-row scale
        o_ref[...] = (x * scale.astype(x.dtype)).astype(o_ref.dtype)

    return kernel


def _pick_tile_rows(rows, hidden, itemsize):
    """Pick a row-tile sized for VMEM (~4 MiB per input block), aligned to the
    packed sublane tile, keeping >=2 grid steps when rows allow it."""
    # Sublane packing: 8 for 32-bit, 16 for 16-bit, 32 for 8-bit dtypes.
    sub = 8 if itemsize >= 4 else (16 if itemsize == 2 else 32)

    # Budget ~4 MiB per input block.  With double-buffered in + out plus the f32
    # reduction temp this keeps total live VMEM well under v7x's 64 MiB.
    target_block_bytes = 4 * 1024 * 1024
    # Account for the f32 upcast used in the reduction.
    bytes_per_row = hidden * max(itemsize, 4)
    tile = max(sub, target_block_bytes // max(bytes_per_row, 1))
    tile = max(sub, (tile // sub) * sub)

    rows_up = max(sub, ((rows + sub - 1) // sub) * sub)
    if tile >= rows_up:
        # Whole input fits in one tile; if there is enough work, split into ~2
        # steps so the parallel grid axis can use both v7x TensorCores.
        if rows >= 2 * sub:
            tile = max(sub, pl.cdiv(rows, 2 * sub) * sub)
        else:
            tile = rows_up
    return tile


def normalization(x, eps=1e-05, *, tile_rows=None):
    """eps * x / ||x||_2 along the last axis (matches the PyTorch module, dim=-1)."""
    orig_shape = x.shape
    orig_dtype = x.dtype
    hidden = orig_shape[-1]
    rows = 1
    for d in orig_shape[:-1]:
        rows *= d

    x2d = x.reshape(rows, hidden)

    itemsize = jnp.dtype(orig_dtype).itemsize
    if tile_rows is None:
        tile_rows = _pick_tile_rows(rows, hidden, itemsize)

    kernel = _make_l2_normalize_kernel(eps)

    out2d = pl.pallas_call(
        kernel,
        out_shape=jax.ShapeDtypeStruct((rows, hidden), orig_dtype),
        grid=(pl.cdiv(rows, tile_rows),),
        in_specs=[pl.BlockSpec((tile_rows, hidden), lambda i: (i, 0))],
        out_specs=pl.BlockSpec((tile_rows, hidden), lambda i: (i, 0)),
        compiler_params=pltpu.CompilerParams(
            dimension_semantics=("parallel",),
            vmem_limit_bytes=48 * 1024 * 1024,
        ),
    )(x2d)

    return out2d.reshape(orig_shape)


if __name__ == "__main__":
    key = jax.random.PRNGKey(0)
    # Small shape consistent with a transformer activation: (batch=2, seq=8, hidden=32)
    x = jax.random.normal(key, (2, 8, 32), dtype=jnp.float32)

    out = normalization(x, eps=1e-05)
    out = jax.block_until_ready(out)

    # Pure-JAX reference check
    ref = 1e-05 * x / jnp.linalg.norm(x, ord=2, axis=-1, keepdims=True)
    assert out.shape == x.shape
    assert jnp.allclose(out, ref, rtol=1e-5, atol=1e-9), "mismatch vs reference"

    print("KERNEL_OK")
</pallas_src>

<mosaic_0001>
module attributes {stable_mosaic.version = 11 : i64} {
  func.func @kernel(%arg0: i32, %arg1: memref<8x32xf32, #tpu.memory_space<vmem>>, %arg2: memref<8x32xf32, #tpu.memory_space<vmem>>) attributes {dimension_semantics = [#tpu.dimension_semantics<parallel>], iteration_bounds = array<i64: 2>, scalar_prefetch = 0 : i64, scratch_operands = 0 : i64, tpu.core_type = #tpu.core_type<tc>, window_params = [{transform_indices = @transform_0, window_bounds = array<i64: 8, 32>}, {transform_indices = @transform_1, window_bounds = array<i64: 8, 32>}]} {
    %c0 = arith.constant 0 : index
    %c0_0 = arith.constant 0 : index
    %0 = vector.load %arg1[%c0, %c0_0] : memref<8x32xf32, #tpu.memory_space<vmem>>, vector<8x32xf32>
    %1 = arith.mulf %0, %0 : vector<8x32xf32>
    %cst = arith.constant dense<0.000000e+00> : vector<8xf32>
    %2 = vector.multi_reduction <add>, %1, %cst [1] : vector<8x32xf32> to vector<8xf32>
    %3 = vector.shape_cast %2 : vector<8xf32> to vector<8x1xf32>
    %4 = math.rsqrt %3 : vector<8x1xf32>
    %cst_1 = arith.constant 9.99999974E-6 : f32
    %5 = vector.broadcast %cst_1 : f32 to vector<8x1xf32>
    %6 = arith.mulf %5, %4 : vector<8x1xf32>
    %7 = vector.broadcast %6 : vector<8x1xf32> to vector<8x32xf32>
    %8 = arith.mulf %0, %7 : vector<8x32xf32>
    %c0_2 = arith.constant 0 : index
    %c0_3 = arith.constant 0 : index
    %9 = vector.load %arg2[%c0_2, %c0_3] : memref<8x32xf32, #tpu.memory_space<vmem>>, vector<8x32xf32>
    tpu.vector_store %arg2[%c0_2, %c0_3], %8 {strides = array<i32>} : memref<8x32xf32, #tpu.memory_space<vmem>>, vector<8x32xf32>,
    return
  }
  func.func @transform_0(%arg0: i32) -> (i32, i32) {
    %c0_i32 = arith.constant 0 : i32
    %c0_i32_0 = arith.constant 0 : i32
    return %arg0, %c0_i32 : i32, i32
  }
  func.func @transform_1(%arg0: i32) -> (i32, i32) {
    %c0_i32 = arith.constant 0 : i32
    %c0_i32_0 = arith.constant 0 : i32
    return %arg0, %c0_i32 : i32, i32
  }
}

</mosaic_0001>

<bundles_post_ra>
// kernel: tpu_custom_call.1
= control target key start
LH: loop header
LB: loop body
LE: loop exit
PB: predicated region body
PF: predicated region fallthrough
CT: control target
= control target key end

     0   :  { %6 = vsyncpa [#allocation3], 0  ;;  %s557_s0 = inlined_call_operand.hbm [shape: f32[16,32], index: 0, kind: input, shape index: {}]   ;;  %s558_s1 = inlined_call_operand.hbm [shape: f32[16,32], index: 1, kind: output, shape index: {}]  }
   0x1   :  { %8 = vsyncpa [#allocation3 + $0x1], 0 }
   0x2   :  { %9 = vsyncpa [#allocation4], 0 }
   0x3   :  { %11 = vsyncpa [#allocation4 + $0x1], 0  ;;  %s396_s6 = smov 0   ;;  %s398_s7 = smov 0  }
   0x4   :  { %s400_s8 = smov 0   ;;  %s402_s9 = smov 0  }
   0x5 LB: > { %s417_s10 = sadd.s32 4294967295, %s382_s9   ;;  %s226_s11 = sadd.s32 4294967294, %s382_s9   ;;  %s382_s9 = sphi %s402_s9, %s573_s9   ;;  %s378_s8 = sphi %s400_s8, %s572_s8   ;;  %s374_s7 = sphi %s398_s7, %s571_s7   ;;  %s370_s6 = sphi %s396_s6, %s570_s6  }
   0x6   : > { %s421_s12 = sadd.s32 1, %s382_s9   ;;  %s24_s13 = sadd.s32 1, %s378_s8 }
   0x7   : > { %s21_s14 = ssub.s32 %s382_s9, %s421_s12  ;;  %p31_p0 = scmp.ne.s32.totalorder %s378_s8, %s374_s7 }
   0x8   : > { %p22_p1 = scmp.eq.s32.totalorder %s21_s14, 0  ;;  %p32_p2 = scmp.eq.s32.totalorder %s382_s9, 0 }
   0x9   : > { %p37_p3 = scmp.ne.s32.totalorder %s374_s7, %s370_s6  ;;  %p38_p4 = scmp.eq.s32.totalorder %s417_s10, 0 }
   0xa   : > { %s433_s15 = scalar_select %p22_p1, %s378_s8, %s24_s13  }
   0xb   : > { %p435_p5 = por %p32_p2, %p31_p0  ;;  %p439_p6 = por %p38_p4, %p37_p3 }
   0xc   : > { %p61_p7 = scmp.eq.s32.totalorder %s417_s10, 1  ;;  %p67_p8 = scmp.eq.s32.totalorder %s226_s11, 1 }
   0xd   : > { %p250_p10 = scmp.lt.s32.totalorder %s382_s9, 2  ;;  %s87_s20 = sand.u32 1, %s378_s8  }
   0xe   : > { %p446_p11 = por %p61_p7, %p31_p0  ;;  %p450_p12 = por %p67_p8, %p37_p3 }
   0xf   : > { %s230_s21 = sshll.u32 %s382_s9, 7  ;;  %s229_s22 = sshll.u32 %s87_s20, 3 }
  0x10   : > { %s562_s18 = scalar_select %p446_p11, 1, 0 }
  0x11   : > { %s563_s19 = scalar_select %p450_p12, 1, 0 }
  0x12   : > { %s459_s25 = scalar_lea.hbm %s557_s0, %s230_s21  ;;  %s91_s26 = scalar_lea.vmem [#allocation2], %s229_s22 }
  0x13   : > { %s98_s27 = sshll.u32 %s91_s26, 4  ;;  %p463_p13 = pnand %p250_p10, %p435_p5  ;;  %s467_s27 = int_to_ptr.vmem [resolvable:$true] %s98_s27 }
  0x14   : > { %s88_s29 = scalar_lea.sflag [#allocation3], %s87_s20  ;;  %s286_s30 = scalar_lea.hbm %s459_s25, 128 }
  0x15   : > { %p287_p2 = scmp.ne.s32.totalorder %s459_s25, %s286_s30  ;;  %p288_p3 = pneg %p463_p13 }
  0x16   : > { %s291_s4 = scalar_lea.hbm %s557_s0, 256  ;;  %p292_p5 = scmp.lt.u32.totalorder %s459_s25, %s557_s0 }
  0x17   : > { %p289_p4 = pnand %p288_p3, %p287_p2  ;;  %p293_p8 = scmp.lt.u32.totalorder %s291_s4, %s286_s30 }
  0x18   : > { %p295_p9 = scmp.lt.u32.totalorder %s286_s30, %s459_s25 }
  0x19   : > { %p290_p7 = pneg %p289_p4  ;;  %p294_p10 = por %p293_p8, %p292_p5 }
  0x1b   : > { %p296_p0 = por %p295_p9, %p294_p10 }
  0x1d   : > { %p297_p1 = pnand %p296_p0, %p290_p7 }
  0x1f   : > { %300 = shalt.err (!%p297_p1)
}
  0x20   : > { %s301_s13 = scalar_lea.vmem %s467_s27, 128  ;;  %s384_s14 = smov [#allocation2]  }
  0x21   : > { %p302_p2 = scmp.ne.s32.totalorder %s467_s27, %s301_s13  ;;  %s306_s16 = sshll.u32 %s384_s14, 4  ;;  %s307_s16 = int_to_ptr.vmem [resolvable:$false] %s306_s16 }
  0x22   : > { %s308_s20 = scalar_lea.vmem %s307_s16, 256  ;;  %p309_p11 = scmp.lt.s32.totalorder %s467_s27, %s307_s16 }
  0x23   : > { %p304_p4 = pnand %p302_p2, %p288_p3  ;;  %p310_p5 = scmp.lt.s32.totalorder %s308_s20, %s301_s13 }
  0x25   : > { %p305_p12 = pneg %p304_p4  ;;  %p311_p8 = por %p310_p5, %p309_p11 }
  0x27   : > { %p312_p9 = pnand %p311_p8, %p305_p12 }
  0x29   : > { %315 = shalt.err (!%p312_p9)
}
  0x2a   : > { %245 = dma.hbm_to_vmem [thread:$0]  (!%p463_p13), %s459_s25, 128, %s467_s27, %s88_s29  }
  0x2b   : > { %p565_p0 = scmp.lt.s32.totalorder %s382_s9, 3  ;;  %p566_p1 = scmp.ge.s32.totalorder %s382_s9, 1 }
  0x2d   : > { %p104_p3 = pnand %p566_p1, %p565_p0 }
  0x2e   : > { %s501_s21 = sand.u32 (!%p104_p3), 1, %s374_s7  }
  0x2f   : > { %107 = sbr.rel (%p104_p3) target bundleno = 230 (0xe6), region = 24  ;;  %s232_s22 = sshll.u32 (!%p104_p3), %s501_s21, 3 }
  0x30   : > { %s110_s23 = scalar_lea.sflag (!%p104_p3), [#allocation3], %s501_s21  ;;  %s113_s24 = scalar_lea.vmem (!%p104_p3), [#allocation2], %s232_s22 }
  0x36   : > { %361 = dma.done.wait (%p439_p6), %s110_s23, 128  }
  0x37   : > { %363 = vsyncadd (%p439_p6), %s110_s23, 4294967168  ;;  %v132_v0 = vld [vmem:[%s113_s24] sm:$0xff]  ;;  %vm134_vm0 = vcmask 261120   ;;  %s235_s25 = sshll.u32 %s417_s10, 7  ;;  %s131_s26 = scalar_lea.vmem [#allocation5], %s232_s22 }
  0x38   : > { %v133_v1 = vmul.f32 %v132_v0, %v132_v0  ;;  %s156_s27 = sshll.u32 %s131_s26, 4  ;;  %s513_s17 = scalar_lea.hbm %s558_s1, %s235_s25  ;;  %s515_s27 = int_to_ptr.vmem [resolvable:$true] %s156_s27 }
  0x39   : > { %s143_s30 = scalar_lea.sflag [#allocation4], %s501_s21  ;;  %s316_s2 = scalar_lea.vmem %s515_s27, 128 }
  0x3a   : > { %v135_v2 = vsel %vm134_vm0, %v133_v1, 0.0  ;;  %p317_p6 = scmp.ne.s32.totalorder %s515_s27, %s316_s2  ;;  %p567_p11 = scmp.ne.s32.totalorder %s562_s18, 0 }
  0x3b   : > { %136 = vadd.xlane.f32.xlu0 %v135_v2  ;;  %s385_s10 = smov [#allocation5]  }
  0x3c   : > { %p318_p12 = pnand %p317_p6, %p567_p11  ;;  %s320_s3 = sshll.u32 %s385_s10, 4  ;;  %s321_s3 = int_to_ptr.vmem [resolvable:$false] %s320_s3 }
  0x3d   : > { %s322_s4 = scalar_lea.vmem %s321_s3, 256  ;;  %p323_p7 = scmp.lt.s32.totalorder %s515_s27, %s321_s3 }
  0x3e   : > { %p319_p13 = pneg %p318_p12  ;;  %p324_p10 = scmp.lt.s32.totalorder %s322_s4, %s316_s2 }
  0x40   : > { %p325_p2 = por %p324_p10, %p323_p7 }
  0x42   : > { %p326_p4 = pnand %p325_p2, %p319_p13 }
  0xc8   : > { %v137_v3 = vpop.xlane.xlu0 %136 }
  0xc9   : > { %284 = vrsqrt.f32 %v137_v3 }
  0xd3   : > { %v285_v4 = vpop.eup %284 }
  0xd4   : > { %v139_v5 = vmul.f32 1e-05, %v285_v4 }
  0xd6   : > { %v140_v6 = vmul.f32 %v139_v5, %v132_v0 }
  0xd8   : > { %141 = vst.msk [vmem:[%s131_s26] sm:$0xff] %vm134_vm0, %v140_v6 }
  0xd9   : > { %329 = shalt.err (!%p326_p4)
}
  0xda   : > { %s330_s5 = scalar_lea.hbm %s513_s17, 128  ;;  %s334_s14 = scalar_lea.hbm %s558_s1, 256 }
  0xdb   : > { %p331_p5 = scmp.ne.s32.totalorder %s513_s17, %s330_s5  ;;  %p335_p0 = scmp.lt.u32.totalorder %s513_s17, %s558_s1 }
  0xdc   : > { %p336_p1 = scmp.lt.u32.totalorder %s334_s14, %s330_s5  ;;  %p338_p6 = scmp.lt.u32.totalorder %s330_s5, %s513_s17 }
  0xdd   : > { %p332_p8 = pnand %p331_p5, %p567_p11 }
  0xde   : > { %p337_p3 = por %p336_p1, %p335_p0 }
  0xdf   : > { %p333_p9 = pneg %p332_p8 }
  0xe0   : > { %p339_p12 = por %p338_p6, %p337_p3 }
  0xe2   : > { %p340_p13 = pnand %p339_p12, %p333_p9 }
  0xe4   : > { %343 = shalt.err (!%p340_p13)
}
  0xe5   : > { %240 = dma.vmem_to_hbm [thread:$0]  (%p567_p11), %s515_s27, 128, %s513_s17, %s143_s30  }
  0xe6 PF: > { %s168_s21 = sand.u32 1, %s370_s6   ;;  %p568_p7 = scmp.ne.s32.totalorder %s563_s19, 0 }
  0xe7   : > { %p569_p10 = scmp.ge.s32.totalorder %s382_s9, 2  ;;  %s169_s22 = scalar_lea.sflag [#allocation4], %s168_s21 }
  0xe9   : > { %p247_p2 = pnand %p569_p10, %p568_p7 }
  0xeb   : > { %365 = dma.done.wait (!%p247_p2), %s169_s22, 128  }
  0xec   : > { %367 = vsyncadd (!%p247_p2), %s169_s22, 4294967168  ;;  %p14_p4 = scmp.ge.s32.totalorder %s421_s12, 4   ;;  %s570_s6 = smov %s374_s7 }
  0xed   : > { %s571_s7 = smov %s378_s8  ;;  %s572_s8 = smov %s433_s15 }
  0xee   : > { %s573_s9 = smov %s421_s12  ;;  %16 = sbr.rel (!%p14_p4) target bundleno = 5 (0x5), region = 69 }
  0xf5   :  { %174 = vsyncpa [#allocation3], 1 }
  0xf6   :  { %176 = vsyncpa [#allocation3 + $0x1], 1 }
  0xf7   :  { %177 = vsyncpa [#allocation4], 1 }
  0xf8   :  { %179 = vsyncpa [#allocation4 + $0x1], 1 }

</bundles_post_ra>
